<compile_context>
chip_gen: v6e
topology: v6e:2x2x1
jax: 0.10.0
libtpu: 0.0.40
codegen_flags: <defaults>
</compile_context>

<pallas_src>
import functools

import jax
import jax.numpy as jnp
from jax.experimental import pallas as pl
from jax.experimental.pallas import tpu as pltpu


def _round_up(v, m):
    return ((v + m - 1) // m) * m


def _pick_rows(total_rows, in_cols, out_cols, itemsize,
               target_out_bytes=4 << 20, vmem_budget=16 << 20):
    """Rows per grid step.

    Big enough to amortize the ~0.35us per-grid-step overhead (target ~4 MiB
    of output per step), small enough that double-buffered in/out tiles plus
    the replicated-x intermediate stay inside a conservative VMEM budget, and
    split so the grid has >= 2 steps (v7x megacore) whenever there is work.
    """
    out_row = out_cols * itemsize
    in_row = in_cols * itemsize
    t = target_out_bytes // out_row
    per_row = 2 * in_row + 3 * out_row          # dbuf in + dbuf out + x_rep temp
    t = min(t, max(1, vmem_budget // per_row))
    t = max(8, (t // 8) * 8)                    # multiple of 8 sublanes
    t = min(t, _round_up(total_rows, 8))
    if total_rows >= 16 and t >= total_rows:
        # keep >= 2 grid steps so the parallel axis can shard across 2 TCs
        t = _round_up(-(-total_rows // 2), 8)
    return int(t)


def _dgm_kernel_flat(x_ref, m_ref, inv_s_ref, o_ref, *, K):
    # Fallback path (K*p >= 128 or packing not applicable).
    # x_ref: [tn, p], m_ref/inv_s_ref: [1, K*p], o_ref: [tn, K*p]
    x_rep = jnp.tile(x_ref[...], (1, K))                    # lane replication
    o_ref[...] = (x_rep - m_ref[...]) * inv_s_ref[...]


def _dgm_kernel_packed(x_ref, m_ref, inv_s_ref, o_ref, *, r, p, K):
    # Lane-packed path: r batch rows per output row, output is 128-lane dense.
    # x_ref: [tn, r*p], m_ref/inv_s_ref: [1, r*K*p], o_ref: [tn, r*K*p]
    x = x_ref[...]
    pieces = []
    for j in range(r):                                      # static unroll
        xj = x[:, j * p:(j + 1) * p]                        # static lane slice
        pieces.extend([xj] * K)                             # replicate K times
    x_rep = jnp.concatenate(pieces, axis=1)                 # [tn, r*K*p]
    o_ref[...] = (x_rep - m_ref[...]) * inv_s_ref[...]


def dgm_forward(x, m, log_s):
    """Pallas implementation of DiagGaussianMixtEM.forward for 2-D x.

    x:     [N, p]   float32
    m:     [K, p]   float32
    log_s: [K, p]   float32
    returns [N, K, p] float32
    """
    N, p = x.shape
    K = m.shape[0]
    Kp = K * p
    dtype = x.dtype
    itemsize = int(jnp.dtype(dtype).itemsize)

    # Hoist the transcendental out of the kernel (tiny [K, p] array).
    # Note: multiplying by exp(-log_s) instead of dividing by exp(log_s) is
    # within ~1 ulp of the PyTorch reference.
    inv_s_flat = jnp.exp(-log_s).astype(dtype).reshape(-1)
    m_flat = m.reshape(-1).astype(dtype)

    # Lane packing factor r: group r batch rows per output row so the output
    # block's last dim is exactly 128 lanes.
    r = 1
    if Kp < 128 and 128 % Kp == 0:
        r_cand = 128 // Kp
        if N % r_cand == 0:
            r = r_cand

    if r > 1:
        rows, in_cols, out_cols = N // r, r * p, r * Kp     # out_cols == 128
        x_in = x.reshape(rows, in_cols)                     # free metadata reshape
        m_in = jnp.tile(m_flat, (r,)).reshape(1, out_cols)
        s_in = jnp.tile(inv_s_flat, (r,)).reshape(1, out_cols)
        kernel = functools.partial(_dgm_kernel_packed, r=r, p=p, K=K)
    else:
        rows, in_cols, out_cols = N, p, Kp
        x_in = x
        m_in = m_flat.reshape(1, Kp)
        s_in = inv_s_flat.reshape(1, Kp)
        kernel = functools.partial(_dgm_kernel_flat, K=K)

    tn = _pick_rows(rows, in_cols, out_cols, itemsize)
    n_blocks = int(pl.cdiv(rows, tn))

    cost = pl.CostEstimate(
        flops=2 * N * Kp,
        transcendentals=0,
        bytes_accessed=itemsize * (N * p + 2 * r * Kp + N * Kp),
    )

    out2 = pl.pallas_call(
        kernel,
        out_shape=jax.ShapeDtypeStruct((rows, out_cols), dtype),
        grid_spec=pltpu.PrefetchScalarGridSpec(
            num_scalar_prefetch=0,
            grid=(n_blocks,),
            in_specs=[
                pl.BlockSpec((tn, in_cols), lambda i: (i, 0)),    # x batch tile
                pl.BlockSpec((1, out_cols), lambda i: (0, 0)),    # m (resident)
                pl.BlockSpec((1, out_cols), lambda i: (0, 0)),    # 1/exp(log_s)
            ],
            out_specs=pl.BlockSpec((tn, out_cols), lambda i: (i, 0)),
        ),
        compiler_params=pltpu.CompilerParams(
            dimension_semantics=("parallel",),
            vmem_limit_bytes=32 * 1024 * 1024,
        ),
        cost_estimate=cost,
    )(x_in, m_in, s_in)

    # Free row-major reshape (no data movement): [rows, out_cols] == [N, K, p].
    return out2.reshape(N, K, p)


def dgm_forward_ref(x, m, log_s):
    # Pure-JAX reference (mirrors the PyTorch expand/broadcast semantics).
    return (x[:, None, :] - m[None, :, :]) / jnp.exp(log_s)[None, :, :]


if __name__ == "__main__":
    key = jax.random.PRNGKey(0)
    k_samples, k_idx, k_x, k_x2, k_m3, k_s3, k_x3 = jax.random.split(key, 7)

    # --- Module __init__ setup (deterministic, in-script) -------------------
    n_samples, p, K = 64, 8, 4
    target_samples = jax.random.normal(k_samples, (n_samples, p), jnp.float32)

    # m = target_samples[randint(0, n_samples, [K])]
    idx = jax.random.randint(k_idx, (K,), 0, n_samples)
    m = target_samples[idx]                                        # [K, p]

    # log_s = log(var(target_samples, dim=0)).repeat(K, 1) / 2
    var = jnp.var(target_samples, axis=0, ddof=1)                  # torch.var is unbiased
    log_s = jnp.tile(jnp.log(var)[None, :] / 2.0, (K, 1))          # [K, p]

    # --- forward: lane-packed path (K*p = 32 < 128), two full grid steps ----
    N = 64
    x = jax.random.normal(k_x, (N, p), jnp.float32)
    out = jax.block_until_ready(dgm_forward(x, m, log_s))
    assert out.shape == (N, K, p)
    assert jnp.allclose(out, dgm_forward_ref(x, m, log_s), atol=1e-5, rtol=1e-5)

    # --- forward: lane-packed path with a ragged final block (no pad/slice) -
    N2 = 88
    x2 = jax.random.normal(k_x2, (N2, p), jnp.float32)
    out2 = jax.block_until_ready(dgm_forward(x2, m, log_s))
    assert out2.shape == (N2, K, p)
    assert jnp.allclose(out2, dgm_forward_ref(x2, m, log_s), atol=1e-5, rtol=1e-5)

    # --- forward: fallback path (K*p not a divisor of 128), ragged N --------
    K3, p3, N3 = 3, 5, 18
    m3 = jax.random.normal(k_m3, (K3, p3), jnp.float32)
    log_s3 = 0.1 * jax.random.normal(k_s3, (K3, p3), jnp.float32)
    x3 = jax.random.normal(k_x3, (N3, p3), jnp.float32)
    out3 = jax.block_until_ready(dgm_forward(x3, m3, log_s3))
    assert out3.shape == (N3, K3, p3)
    assert jnp.allclose(out3, dgm_forward_ref(x3, m3, log_s3), atol=1e-5, rtol=1e-5)

    print("KERNEL_OK")
</pallas_src>

<mosaic_0001>
module attributes {stable_mosaic.version = 11 : i64} {
  func.func @_dgm_kernel_packed(%arg0: i32, %arg1: memref<8x32xf32, #tpu.memory_space<vmem>>, %arg2: memref<1x128xf32, #tpu.memory_space<vmem>>, %arg3: memref<1x128xf32, #tpu.memory_space<vmem>>, %arg4: memref<8x128xf32, #tpu.memory_space<vmem>>) attributes {dimension_semantics = [#tpu.dimension_semantics<parallel>], iteration_bounds = array<i64: 2>, scalar_prefetch = 0 : i64, scratch_operands = 0 : i64, tpu.core_type = #tpu.core_type<tc>, window_params = [{transform_indices = @transform_0, window_bounds = array<i64: 8, 32>}, {pipeline_mode = #tpu.pipeline_mode<synchronous>, transform_indices = @transform_1, window_bounds = array<i64: 1, 128>}, {pipeline_mode = #tpu.pipeline_mode<synchronous>, transform_indices = @transform_2, window_bounds = array<i64: 1, 128>}, {transform_indices = @transform_3, window_bounds = array<i64: 8, 128>}]} {
    %c0 = arith.constant 0 : index
    %c0_0 = arith.constant 0 : index
    %0 = vector.load %arg1[%c0, %c0_0] : memref<8x32xf32, #tpu.memory_space<vmem>>, vector<8x32xf32>
    %1 = vector.extract_strided_slice %0 {offsets = [0, 0], sizes = [8, 8], strides = [1, 1]} : vector<8x32xf32> to vector<8x8xf32>
    %2 = vector.extract_strided_slice %0 {offsets = [0, 8], sizes = [8, 8], strides = [1, 1]} : vector<8x32xf32> to vector<8x8xf32>
    %3 = vector.extract_strided_slice %0 {offsets = [0, 16], sizes = [8, 8], strides = [1, 1]} : vector<8x32xf32> to vector<8x8xf32>
    %4 = vector.extract_strided_slice %0 {offsets = [0, 24], sizes = [8, 8], strides = [1, 1]} : vector<8x32xf32> to vector<8x8xf32>
    %5 = tpu.concatenate %1, %1, %1, %1, %2, %2, %2, %2, %3, %3, %3, %3, %4, %4, %4, %4 in 1 : vector<8x8xf32>, vector<8x8xf32>, vector<8x8xf32>, vector<8x8xf32>, vector<8x8xf32>, vector<8x8xf32>, vector<8x8xf32>, vector<8x8xf32>, vector<8x8xf32>, vector<8x8xf32>, vector<8x8xf32>, vector<8x8xf32>, vector<8x8xf32>, vector<8x8xf32>, vector<8x8xf32>, vector<8x8xf32> -> vector<8x128xf32>
    %c0_1 = arith.constant 0 : index
    %c0_2 = arith.constant 0 : index
    %6 = vector.load %arg2[%c0_1, %c0_2] : memref<1x128xf32, #tpu.memory_space<vmem>>, vector<1x128xf32>
    %7 = vector.broadcast %6 : vector<1x128xf32> to vector<8x128xf32>
    %8 = arith.subf %5, %7 : vector<8x128xf32>
    %c0_3 = arith.constant 0 : index
    %c0_4 = arith.constant 0 : index
    %9 = vector.load %arg3[%c0_3, %c0_4] : memref<1x128xf32, #tpu.memory_space<vmem>>, vector<1x128xf32>
    %10 = vector.broadcast %9 : vector<1x128xf32> to vector<8x128xf32>
    %11 = arith.mulf %8, %10 : vector<8x128xf32>
    %c0_5 = arith.constant 0 : index
    %c0_6 = arith.constant 0 : index
    %12 = vector.load %arg4[%c0_5, %c0_6] : memref<8x128xf32, #tpu.memory_space<vmem>>, vector<8x128xf32>
    tpu.vector_store %arg4[%c0_5, %c0_6], %11 {strides = array<i32>} : memref<8x128xf32, #tpu.memory_space<vmem>>, vector<8x128xf32>,
    return
  }
  func.func @transform_0(%arg0: i32) -> (i32, i32) {
    %c0_i32 = arith.constant 0 : i32
    %c0_i32_0 = arith.constant 0 : i32
    return %arg0, %c0_i32 : i32, i32
  }
  func.func @transform_1(%arg0: i32) -> (i32, i32) {
    %c0_i32 = arith.constant 0 : i32
    %c0_i32_0 = arith.constant 0 : i32
    %c0_i32_1 = arith.constant 0 : i32
    return %c0_i32, %c0_i32_0 : i32, i32
  }
  func.func @transform_2(%arg0: i32) -> (i32, i32) {
    %c0_i32 = arith.constant 0 : i32
    %c0_i32_0 = arith.constant 0 : i32
    %c0_i32_1 = arith.constant 0 : i32
    return %c0_i32, %c0_i32_0 : i32, i32
  }
  func.func @transform_3(%arg0: i32) -> (i32, i32) {
    %c0_i32 = arith.constant 0 : i32
    %c0_i32_0 = arith.constant 0 : i32
    return %arg0, %c0_i32 : i32, i32
  }
}

</mosaic_0001>

<bundles_post_ra>
// kernel: tpu_custom_call.1
= control target key start
LH: loop header
LB: loop body
LE: loop exit
PB: predicated region body
PF: predicated region fallthrough
CT: control target
= control target key end

     0   :  { %8 = vsyncpa [#allocation3], 0  ;;  %s706_s0 = inlined_call_operand.hbm [shape: f32[16,32], index: 0, kind: input, shape index: {}]   ;;  %s707_s1 = inlined_call_operand.vmem [shape: f32[1,128], index: 1, kind: input, shape index: {}]   ;;  %s708_s2 = inlined_call_operand.vmem [shape: f32[1,128], index: 2, kind: input, shape index: {}]   ;;  %s709_s3 = inlined_call_operand.hbm [shape: f32[16,128], index: 3, kind: output, shape index: {}]  }
   0x1   :  { %10 = vsyncpa [#allocation3 + $0x1], 0 }
   0x2   :  { %11 = vsyncpa [#allocation4], 0 }
   0x3   :  { %13 = vsyncpa [#allocation4 + $0x1], 0  ;;  %s555_s12 = smov 0   ;;  %s557_s13 = smov 0  }
   0x4   :  { %s559_s14 = smov 0   ;;  %s561_s15 = smov 0  }
   0x5 LB: > { %s576_s16 = sadd.s32 4294967295, %s519_s15   ;;  %s355_s17 = sadd.s32 4294967294, %s519_s15   ;;  %s519_s15 = sphi %s561_s15, %s726_s15   ;;  %s515_s14 = sphi %s559_s14, %s725_s14   ;;  %s511_s13 = sphi %s557_s13, %s724_s13   ;;  %s507_s12 = sphi %s555_s12, %s723_s12  }
   0x6   : > { %s580_s18 = sadd.s32 1, %s519_s15   ;;  %s26_s19 = sadd.s32 1, %s515_s14 }
   0x7   : > { %s23_s20 = ssub.s32 %s519_s15, %s580_s18  ;;  %p33_p0 = scmp.ne.s32.totalorder %s515_s14, %s511_s13 }
   0x8   : > { %p24_p1 = scmp.eq.s32.totalorder %s23_s20, 0  ;;  %p34_p2 = scmp.eq.s32.totalorder %s519_s15, 0 }
   0x9   : > { %p39_p3 = scmp.ne.s32.totalorder %s511_s13, %s507_s12  ;;  %p40_p4 = scmp.eq.s32.totalorder %s576_s16, 0 }
   0xa   : > { %s592_s21 = scalar_select %p24_p1, %s515_s14, %s26_s19  }
   0xb   : > { %p594_p5 = por %p34_p2, %p33_p0  ;;  %p598_p6 = por %p40_p4, %p39_p3 }
   0xc   : > { %p105_p7 = scmp.eq.s32.totalorder %s576_s16, 1  ;;  %p111_p8 = scmp.eq.s32.totalorder %s355_s17, 1 }
   0xd   : > { %s713_s23 = scalar_select %p598_p6, 1, 0 }
   0xe   : > { %p381_p10 = scmp.lt.s32.totalorder %s519_s15, 2  ;;  %p605_p11 = por %p105_p7, %p33_p0 }
   0xf   : > { %p609_p12 = por %p111_p8, %p39_p3  ;;  %s137_s26 = sand.u32 1, %s515_s14  }
  0x10   : > { %s714_s24 = scalar_select %p605_p11, 1, 0 }
  0x11   : > { %s715_s25 = scalar_select %p609_p12, 1, 0 }
  0x12   : > { %s359_s27 = sshll.u32 %s519_s15, 7  ;;  %s358_s28 = sshll.u32 %s137_s26, 3 }
  0x13   : > { %s618_s4 = scalar_lea.hbm %s706_s0, %s359_s27  ;;  %s141_s5 = scalar_lea.vmem [#allocation2], %s358_s28 }
  0x14   : > { %s148_s6 = sshll.u32 %s141_s5, 4  ;;  %p622_p13 = pnand %p381_p10, %p594_p5  ;;  %s626_s6 = int_to_ptr.vmem [resolvable:$true] %s148_s6 }
  0x15   : > { %s138_s8 = scalar_lea.sflag [#allocation3], %s137_s26  ;;  %s427_s9 = scalar_lea.hbm %s618_s4, 128 }
  0x16   : > { %p428_p2 = scmp.ne.s32.totalorder %s618_s4, %s427_s9  ;;  %p429_p3 = pneg %p622_p13 }
  0x17   : > { %s432_s17 = scalar_lea.hbm %s706_s0, 256  ;;  %p433_p5 = scmp.lt.s32.totalorder %s618_s4, %s706_s0 }
  0x18   : > { %p430_p4 = pnand %p429_p3, %p428_p2  ;;  %p434_p8 = scmp.lt.s32.totalorder %s432_s17, %s427_s9 }
  0x1a   : > { %p431_p7 = pneg %p430_p4  ;;  %p435_p10 = por %p434_p8, %p433_p5 }
  0x1c   : > { %p436_p9 = pnand %p435_p10, %p431_p7 }
  0x1e   : > { %439 = shalt.err (!%p436_p9)
}
  0x1f   : > { %s440_s22 = scalar_lea.vmem %s626_s6, 128  ;;  %s521_s26 = smov [#allocation2]  }
  0x20   : > { %p441_p0 = scmp.ne.s32.totalorder %s626_s6, %s440_s22  ;;  %s445_s27 = sshll.u32 %s521_s26, 4  ;;  %s446_s27 = int_to_ptr.vmem [resolvable:$false] %s445_s27 }
  0x21   : > { %s447_s28 = scalar_lea.vmem %s446_s27, 256  ;;  %p448_p4 = scmp.lt.s32.totalorder %s626_s6, %s446_s27 }
  0x22   : > { %p443_p1 = pnand %p441_p0, %p429_p3  ;;  %p449_p12 = scmp.lt.s32.totalorder %s447_s28, %s440_s22 }
  0x24   : > { %p444_p2 = pneg %p443_p1  ;;  %p450_p11 = por %p449_p12, %p448_p4 }
  0x26   : > { %p451_p6 = pnand %p450_p11, %p444_p2 }
  0x28   : > { %454 = shalt.err (!%p451_p6)
}
  0x29   : > { %376 = dma.hbm_to_vmem [thread:$0]  (!%p622_p13), %s618_s4, 128, %s626_s6, %s138_s8  }
  0x2a   : > { %p717_p9 = scmp.lt.s32.totalorder %s519_s15, 3  ;;  %p718_p7 = scmp.ge.s32.totalorder %s519_s15, 1 }
  0x2c   : > { %p154_p0 = pnand %p718_p7, %p717_p9 }
  0x2d   : > { %s653_s29 = sand.u32 (!%p154_p0), 1, %s511_s13   ;;  %p719_p6 = scmp.ne.s32.totalorder (!%p154_p0), %s713_s23, 0 }
  0x2e   : > { %157 = sbr.rel (%p154_p0) target bundleno = 207 (0xcf), region = 32  ;;  %s361_s30 = sshll.u32 (!%p154_p0), %s653_s29, 3 }
  0x2f   : > { %s160_s5 = scalar_lea.sflag (!%p154_p0), [#allocation3], %s653_s29  ;;  %s163_s7 = scalar_lea.vmem (!%p154_p0), [#allocation2], %s361_s30 }
  0x33   : > { %498 = dma.done.wait (%p719_p6), %s160_s5, 128  }
  0x34   : > { %500 = vsyncadd (%p719_p6), %s160_s5, 4294967168  ;;  %v186_v0 = vld [vmem:[%s163_s7] sm:$0xff]  ;;  %s522_s4 = smov 8   ;;  %s523_s6 = smov 24   ;;  %vm224_vm0 = vcmask 64512   ;;  %vm226_vm1 = vcmask 130048  }
  0x35   : > { %188 = vrot.lane.b32.xlu0 %v186_v0, %s522_s4  ;;  %194 = vrot.lane.b32.xlu1 %v186_v0, %s523_s6  ;;  %s524_s8 = smov 16   ;;  %s525_s9 = smov 32   ;;  %vm228_vm2 = vcmask 195584   ;;  %vm230_vm3 = vcmask 261120   ;;  %vm232_vm4 = vcmask 326656   ;;  %vm234_vm5 = vcmask 392192  }
  0x36   : > { %s526_s10 = smov 40   ;;  %s527_s11 = smov 48   ;;  %vm236_vm6 = vcmask 457728   ;;  %vm238_vm7 = vcmask 523264   ;;  %vm240_vm8 = vcmask 588800   ;;  %vm242_vm9 = vcmask 654336  }
  0x37   : > { %s528_s17 = smov 56   ;;  %s529_s19 = smov 64   ;;  %vm244_vm10 = vcmask 719872   ;;  %vm246_vm11 = vcmask 785408   ;;  %vm248_vm12 = vcmask 850944   ;;  %vm250_vm13 = vcmask 916480  }
  0x38   : > { %s530_s20 = smov 72   ;;  %s531_s23 = smov 80   ;;  %vm252_vm14 = vcmask 982016   ;;  %v363_v25 = vld [vmem:[%s707_s1] ss:$0 sm:$0xff] }
  0x39   : > { %191 = vrot.lane.b32.xlu0 %v186_v0, %s524_s8  ;;  %197 = vrot.lane.b32.xlu1 %v186_v0, %s525_s9  ;;  %s532_s22 = smov 88   ;;  %s533_s26 = smov 96   ;;  %v364_v28 = vld [vmem:[%s708_s2] ss:$0 sm:$0xff] }
  0x3a   : > { %s366_s4 = sshll.u32 %s576_s16, 7  ;;  %s185_s6 = scalar_lea.vmem [#allocation5], %s361_s30 }
  0x3b   : > { %s285_s8 = sshll.u32 %s185_s6, 4  ;;  %p720_p12 = scmp.ne.s32.totalorder %s714_s24, 0  ;;  %s286_s8 = int_to_ptr.vmem [resolvable:$true] %s285_s8 }
  0x3d   : > { %200 = vrot.lane.b32.xlu0 %v186_v0, %s526_s10  ;;  %203 = vrot.lane.b32.xlu1 %v186_v0, %s527_s11  ;;  %s283_s11 = scalar_lea.hbm %s709_s3, %s366_s4 }
  0x41   : > { %206 = vrot.lane.b32.xlu0 %v186_v0, %s528_s17  ;;  %209 = vrot.lane.b32.xlu1 %v186_v0, %s529_s19  ;;  %s272_s17 = scalar_lea.sflag [#allocation4], %s653_s29  ;;  %s455_s19 = scalar_lea.vmem %s286_s8, 128 }
  0x42   : > { %p456_p11 = scmp.ne.s32.totalorder %s286_s8, %s455_s19 }
  0x44   : > { %p457_p13 = pnand %p456_p11, %p720_p12 }
  0x45   : > { %212 = vrot.lane.b32.xlu0 %v186_v0, %s530_s20  ;;  %215 = vrot.lane.b32.xlu1 %v186_v0, %s531_s23  ;;  %s534_s20 = smov [#allocation5]  }
  0x46   : > { %p458_p1 = pneg %p457_p13  ;;  %s459_s23 = sshll.u32 %s534_s20, 4  ;;  %s460_s23 = int_to_ptr.vmem [resolvable:$false] %s459_s23 }
  0x47   : > { %s461_s16 = scalar_lea.vmem %s460_s23, 256  ;;  %p462_p3 = scmp.lt.s32.totalorder %s286_s8, %s460_s23 }
  0x48   : > { %p463_p5 = scmp.lt.s32.totalorder %s461_s16, %s455_s19 }
  0x49   : > { %218 = vrot.lane.b32.xlu0 %v186_v0, %s532_s22  ;;  %221 = vrot.lane.b32.xlu1 %v186_v0, %s533_s26 }
  0x4a   : > { %p464_p8 = por %p463_p5, %p462_p3 }
  0x4c   : > { %p465_p10 = pnand %p464_p8, %p458_p1 }
  0xa7   : > { %v189_v1 = vpop.permute.xlu0 %188  ;;  %v195_v2 = vpop.permute.xlu1 %194 }
  0xa8   : > { %v225_v3 = vsel %vm224_vm0, %v186_v0, %v189_v1 }
  0xab   : > { %v192_v4 = vpop.permute.xlu0 %191  ;;  %v198_v5 = vpop.permute.xlu1 %197 }
  0xac   : > { %v227_v6 = vsel %vm226_vm1, %v225_v3, %v192_v4 }
  0xad   : > { %v229_v7 = vsel %vm228_vm2, %v227_v6, %v195_v2 }
  0xae   : > { %v231_v8 = vsel %vm230_vm3, %v229_v7, %v195_v2 }
  0xaf   : > { %v233_v9 = vsel %vm232_vm4, %v231_v8, %v198_v5  ;;  %v201_v10 = vpop.permute.xlu0 %200  ;;  %v204_v11 = vpop.permute.xlu1 %203 }
  0xb0   : > { %v235_v12 = vsel %vm234_vm5, %v233_v9, %v201_v10 }
  0xb1   : > { %v237_v13 = vsel %vm236_vm6, %v235_v12, %v204_v11 }
  0xb2   : > { %v239_v14 = vsel %vm238_vm7, %v237_v13, %v204_v11 }
  0xb3   : > { %v207_v15 = vpop.permute.xlu0 %206  ;;  %v210_v16 = vpop.permute.xlu1 %209 }
  0xb4   : > { %v241_v17 = vsel %vm240_vm8, %v239_v14, %v207_v15 }
  0xb5   : > { %v243_v18 = vsel %vm242_vm9, %v241_v17, %v210_v16 }
  0xb7   : > { %v213_v19 = vpop.permute.xlu0 %212  ;;  %v216_v20 = vpop.permute.xlu1 %215 }
  0xb8   : > { %v245_v21 = vsel %vm244_vm10, %v243_v18, %v213_v19 }
  0xb9   : > { %v247_v22 = vsel %vm246_vm11, %v245_v21, %v213_v19 }
  0xba   : > { %v249_v23 = vsel %vm248_vm12, %v247_v22, %v216_v20 }
  0xbb   : > { %v219_v24 = vpop.permute.xlu0 %218  ;;  %v222_v26 = vpop.permute.xlu1 %221 }
  0xbc   : > { %v251_v27 = vsel %vm250_vm13, %v249_v23, %v219_v24 }
  0xbd   : > { %v253_v29 = vsel %vm252_vm14, %v251_v27, %v222_v26 }
  0xbe   : > { %v261_v30 = vsub.f32 %v253_v29, %v363_v25 }
  0xc0   : > { %v269_v31 = vmul.f32 %v364_v28, %v261_v30 }
  0xc2   : > { %270 = vst [vmem:[%s185_s6] sm:$0xff] %v269_v31 }
  0xc3   : > { %468 = shalt.err (!%p465_p10)
}
  0xc4   : > { %s469_s30 = scalar_lea.hbm %s283_s11, 128  ;;  %s473_s26 = scalar_lea.hbm %s709_s3, 256 }
  0xc5   : > { %p470_p2 = scmp.ne.s32.totalorder %s283_s11, %s469_s30  ;;  %p474_p7 = scmp.lt.s32.totalorder %s283_s11, %s709_s3 }
  0xc6   : > { %p475_p0 = scmp.lt.s32.totalorder %s473_s26, %s469_s30 }
  0xc7   : > { %p471_p4 = pnand %p470_p2, %p720_p12 }
  0xc8   : > { %p476_p6 = por %p475_p0, %p474_p7 }
  0xc9   : > { %p472_p9 = pneg %p471_p4 }
  0xcb   : > { %p477_p11 = pnand %p476_p6, %p472_p9 }
  0xcd   : > { %480 = shalt.err (!%p477_p11)
}
  0xce   : > { %371 = dma.vmem_to_hbm [thread:$0]  (%p720_p12), %s286_s8, 128, %s283_s11, %s272_s17  }
  0xcf PF: > { %s297_s5 = sand.u32 1, %s507_s12   ;;  %p721_p13 = scmp.ne.s32.totalorder %s715_s25, 0 }
  0xd0   : > { %p722_p1 = scmp.ge.s32.totalorder %s519_s15, 2  ;;  %s298_s7 = scalar_lea.sflag [#allocation4], %s297_s5 }
  0xd2   : > { %p378_p3 = pnand %p722_p1, %p721_p13 }
  0xd4   : > { %p379_p5 = pneg %p378_p3 }
  0xd6   : > { %502 = dma.done.wait (%p379_p5), %s298_s7, 128  }
  0xd7   : > { %504 = vsyncadd (%p379_p5), %s298_s7, 4294967168  ;;  %p16_p8 = scmp.ge.s32.totalorder %s580_s18, 4   ;;  %s723_s12 = smov %s511_s13 }
  0xd8   : > { %s724_s13 = smov %s515_s14  ;;  %s725_s14 = smov %s592_s21 }
  0xd9   : > { %s726_s15 = smov %s580_s18  ;;  %18 = sbr.rel (!%p16_p8) target bundleno = 5 (0x5), region = 77 }
  0xde   :  { %303 = vsyncpa [#allocation3], 1 }
  0xdf   :  { %305 = vsyncpa [#allocation3 + $0x1], 1 }
  0xe0   :  { %306 = vsyncpa [#allocation4], 1 }
  0xe1   :  { %308 = vsyncpa [#allocation4 + $0x1], 1 }

</bundles_post_ra>
